<compile_context>
chip_gen: v6e
topology: v6e:2x2x1
jax: 0.10.0
libtpu: 0.0.40
codegen_flags: <defaults>
</compile_context>

<pallas_src>
import jax
import jax.numpy as jnp
from jax.experimental import pallas as pl
from jax.experimental.pallas import tpu as pltpu


# ----------------------------- Pallas kernel --------------------------------
def clip_mm_kernel(ids_ref, patches_ref, w_patch_ref, tproj_ref, out_ref):
    """Fused CLIP-style forward.

    ids_ref     : (S, 1)      int32  VMEM  token ids
    patches_ref : (Np, Pd)    bf16   VMEM  image patches
    w_patch_ref : (Pd, D)     bf16   VMEM  patch-embedding weight
    tproj_ref   : (vocab, D)  f32    VMEM  pre-projected token table
                                            (= emb @ w_txt @ w_img^T, precomputed)
    out_ref     : (1, 128)    f32    VMEM  scalar result broadcast lane-dense
    """
    # ---- image tower: patch embedding on the bf16 MXU path, f32 accumulate ----
    h = jnp.dot(patches_ref[...], w_patch_ref[...],
                preferred_element_type=jnp.float32)               # (Np, D) f32
    # TODO(synk): PyTorch nn.GELU defaults to exact erf; the tanh approximation
    # is used here (no guaranteed Mosaic erf lowering; CLIP itself uses an
    # approximate GELU).
    h = jax.nn.gelu(h)                                            # f32 (VPU/EUP)
    pooled_img = jnp.mean(h, axis=0, keepdims=True)               # (1, D) f32

    # ---- text tower: vectorized one-hot gather + mean-pool over the
    # pre-projected table (text projection already folded into tproj).
    s_len = ids_ref.shape[0]
    vocab = tproj_ref.shape[0]
    ids = ids_ref[...]                                            # (S, 1) int32
    iota_v = jax.lax.broadcasted_iota(jnp.int32, (s_len, vocab), 1)
    onehot = (ids == iota_v).astype(jnp.float32)                  # (S, vocab)
    weights = jnp.sum(onehot, axis=0, keepdims=True) * (1.0 / s_len)  # (1, vocab)
    txt_proj = jnp.dot(weights, tproj_ref[...],
                       preferred_element_type=jnp.float32)        # (1, D) f32

    # ---- final torch.dot(text_features, image_features) ----
    result = jnp.sum(txt_proj * pooled_img, axis=-1, keepdims=True)   # (1, 1)
    out_ref[...] = jnp.broadcast_to(result, out_ref.shape)        # lane-dense store


# ----------------------------- wrapper ---------------------------------------
def clip_multimodal_classifier(image_nchw, token_ids, params):
    """Forward pass. image_nchw: (1, C, H, W) f32; token_ids: (1, S) int32."""
    C, H, W = image_nchw.shape[1:]
    P = params["patch_size"]
    assert H % P == 0 and W % P == 0

    # Layout glue (pure reshape/transpose; fuses into this jitted program):
    # NCHW -> (num_patches, C*P*P) patch matrix.
    x = image_nchw[0].reshape(C, H // P, P, W // P, P)
    patches = jnp.transpose(x, (1, 3, 0, 2, 4)).reshape(
        (H // P) * (W // P), C * P * P)
    patches = patches.astype(jnp.bfloat16)                        # halve activation DMA

    ids = token_ids.reshape(-1, 1).astype(jnp.int32)              # (S, 1) VMEM input

    w_patch = params["w_patch_bf16"]                              # (Pd, D)    bf16
    tproj = params["t_proj"]                                      # (vocab, D) f32
    # (tproj kept f32: it is tiny and keeping it f32 removes the extra bf16
    #  rounding the text path previously carried.)

    np_, pd = patches.shape
    d = w_patch.shape[1]
    vocab = tproj.shape[0]
    flops = 2 * np_ * pd * d + 2 * vocab * d
    bytes_accessed = (patches.size * 2 + w_patch.size * 2 + tproj.size * 4
                      + ids.size * 4 + 128 * 4)

    out = pl.pallas_call(
        clip_mm_kernel,
        out_shape=jax.ShapeDtypeStruct((1, 128), jnp.float32),
        in_specs=[
            pl.BlockSpec(memory_space=pltpu.MemorySpace.VMEM),    # ids
            pl.BlockSpec(memory_space=pltpu.MemorySpace.VMEM),    # patches
            pl.BlockSpec(memory_space=pltpu.MemorySpace.VMEM),    # w_patch
            pl.BlockSpec(memory_space=pltpu.MemorySpace.VMEM),    # tproj
        ],
        out_specs=pl.BlockSpec(memory_space=pltpu.MemorySpace.VMEM),
        cost_estimate=pl.CostEstimate(
            flops=flops,
            transcendentals=np_ * d,            # gelu tanh per image-tower element
            bytes_accessed=bytes_accessed),
    )(ids, patches, w_patch, tproj)

    return out[0, 0]   # scalar, matching torch.dot(...)


# ----------------------------- param init ------------------------------------
def init_params(key, *, C, P, D, E, vocab, Dt):
    Pd = C * P * P
    ks = jax.random.split(key, 4)
    w_patch = jax.random.normal(ks[0], (Pd, D), jnp.float32) * (Pd ** -0.5)
    w_img = jax.random.normal(ks[1], (D, E), jnp.float32) * (D ** -0.5)
    emb = jax.random.normal(ks[2], (vocab, Dt), jnp.float32) * 0.02
    w_txt = jax.random.normal(ks[3], (Dt, E), jnp.float32) * (Dt ** -0.5)
    # One-time precompute (weights reused across calls):
    #   dot(text_feat, image_feat) = mean(emb[ids]) @ w_txt @ w_img^T @ pooled_img^T
    # so the whole text side collapses into one pre-projected table (vocab, D).
    t_proj = emb @ w_txt @ w_img.T
    return {
        "patch_size": P,
        "w_patch": w_patch,
        "w_img_proj": w_img,
        "w_txt_proj": w_txt,
        "text_embedding": emb,
        # kernel operands
        "w_patch_bf16": w_patch.astype(jnp.bfloat16),
        "t_proj": t_proj.astype(jnp.float32),
    }


if __name__ == "__main__":
    key = jax.random.PRNGKey(0)
    k_img, k_txt, k_par = jax.random.split(key, 3)

    # small shapes consistent with the module's forward semantics (batch = 1
    # because torch.dot requires 1-D feature vectors)
    C, H, W = 4, 16, 16
    P = 8            # -> 4 patches of dim 256
    D = 128          # image tower hidden width
    E = 128          # shared embedding dim
    vocab, S, Dt = 64, 8, 128

    image = jax.random.normal(k_img, (1, C, H, W), jnp.float32)   # NCHW
    text = jax.random.randint(k_txt, (1, S), 0, vocab, jnp.int32)
    params = init_params(k_par, C=C, P=P, D=D, E=E, vocab=vocab, Dt=Dt)

    fwd = jax.jit(lambda img, tok: clip_multimodal_classifier(img, tok, params))
    result = fwd(image, text)
    jax.block_until_ready(result)

    # Pure-JAX reference using the module's original two-projection math,
    # evaluated on the same bf16-rounded image-tower operands the kernel uses.
    x = image[0].reshape(C, H // P, P, W // P, P)
    patches_r = jnp.transpose(x, (1, 3, 0, 2, 4)).reshape(
        (H // P) * (W // P), C * P * P)
    patches_r = patches_r.astype(jnp.bfloat16).astype(jnp.float32)
    w_patch_r = params["w_patch_bf16"].astype(jnp.float32)
    img_feat = jnp.mean(jax.nn.gelu(patches_r @ w_patch_r), axis=0) @ params["w_img_proj"]
    txt_feat = jnp.mean(params["text_embedding"][text[0]], axis=0) @ params["w_txt_proj"]
    ref = jnp.dot(txt_feat, img_feat)

    # bf16 image-tower operands + the fused projection reorder accumulation slightly.
    assert jnp.allclose(result, ref, rtol=3e-2, atol=3e-3), (result, ref)

    print("KERNEL_OK")
</pallas_src>

<mosaic_0001>
module attributes {stable_mosaic.version = 11 : i64} {
  func.func @clip_mm_kernel(%arg0: memref<8x1xi32, #tpu.memory_space<vmem>>, %arg1: memref<4x256xbf16, #tpu.memory_space<vmem>>, %arg2: memref<256x128xbf16, #tpu.memory_space<vmem>>, %arg3: memref<64x128xf32, #tpu.memory_space<vmem>>, %arg4: memref<1x128xf32, #tpu.memory_space<vmem>>) attributes {dimension_semantics = [], scalar_prefetch = 0 : i64, scratch_operands = 0 : i64, tpu.core_type = #tpu.core_type<tc>} {
    %c0 = arith.constant 0 : index
    %c0_0 = arith.constant 0 : index
    %0 = vector.load %arg1[%c0, %c0_0] : memref<4x256xbf16, #tpu.memory_space<vmem>>, vector<4x256xbf16>
    %c0_1 = arith.constant 0 : index
    %c0_2 = arith.constant 0 : index
    %1 = vector.load %arg2[%c0_1, %c0_2] : memref<256x128xbf16, #tpu.memory_space<vmem>>, vector<256x128xbf16>
    %cst = arith.constant dense<0.000000e+00> : vector<4x128xf32>
    %2 = tpu.matmul %0, %1, %cst {dimension_numbers = #tpu.dot_dimension_numbers<[1], [0], [0], [1], [0, 0, 1, 1], [], []>} : vector<4x256xbf16>, vector<256x128xbf16>, vector<4x128xf32> -> vector<4x128xf32>
    %3 = arith.mulf %2, %2 : vector<4x128xf32>
    %4 = arith.mulf %2, %3 : vector<4x128xf32>
    %cst_3 = arith.constant 4.471500e-02 : f32
    %5 = vector.broadcast %cst_3 : f32 to vector<4x128xf32>
    %6 = arith.mulf %5, %4 : vector<4x128xf32>
    %7 = arith.addf %2, %6 : vector<4x128xf32>
    %cst_4 = arith.constant 0.797884583 : f32
    %8 = vector.broadcast %cst_4 : f32 to vector<4x128xf32>
    %9 = arith.mulf %8, %7 : vector<4x128xf32>
    %10 = math.tanh %9 : vector<4x128xf32>
    %cst_5 = arith.constant 1.000000e+00 : f32
    %11 = vector.broadcast %cst_5 : f32 to vector<4x128xf32>
    %12 = arith.addf %11, %10 : vector<4x128xf32>
    %cst_6 = arith.constant 5.000000e-01 : f32
    %13 = vector.broadcast %cst_6 : f32 to vector<4x128xf32>
    %14 = arith.mulf %13, %12 : vector<4x128xf32>
    %15 = arith.mulf %2, %14 : vector<4x128xf32>
    %cst_7 = arith.constant dense<0.000000e+00> : vector<128xf32>
    %16 = vector.multi_reduction <add>, %15, %cst_7 [0] : vector<4x128xf32> to vector<128xf32>
    %17 = vector.shape_cast %16 : vector<128xf32> to vector<1x128xf32>
    %cst_8 = arith.constant 4.000000e+00 : f32
    %18 = vector.broadcast %cst_8 : f32 to vector<1x128xf32>
    %19 = arith.divf %17, %18 : vector<1x128xf32>
    %c0_9 = arith.constant 0 : index
    %c0_10 = arith.constant 0 : index
    %20 = vector.load %arg0[%c0_9, %c0_10] : memref<8x1xi32, #tpu.memory_space<vmem>>, vector<8x1xi32>
    %21 = tpu.iota {dimensions = array<i32: 1>} : vector<8x64xi32>
    %22 = vector.broadcast %20 : vector<8x1xi32> to vector<8x64xi32>
    %23 = arith.cmpi eq, %22, %21 : vector<8x64xi32>
    %24 = arith.extui %23 : vector<8x64xi1> to vector<8x64xi32>
    %25 = arith.sitofp %24 : vector<8x64xi32> to vector<8x64xf32>
    %cst_11 = arith.constant dense<0.000000e+00> : vector<64xf32>
    %26 = vector.multi_reduction <add>, %25, %cst_11 [0] : vector<8x64xf32> to vector<64xf32>
    %27 = vector.shape_cast %26 : vector<64xf32> to vector<1x64xf32>
    %cst_12 = arith.constant 1.250000e-01 : f32
    %28 = vector.broadcast %cst_12 : f32 to vector<1x64xf32>
    %29 = arith.mulf %27, %28 : vector<1x64xf32>
    %c0_13 = arith.constant 0 : index
    %c0_14 = arith.constant 0 : index
    %30 = vector.load %arg3[%c0_13, %c0_14] : memref<64x128xf32, #tpu.memory_space<vmem>>, vector<64x128xf32>
    %cst_15 = arith.constant dense<0.000000e+00> : vector<1x128xf32>
    %31 = tpu.matmul %29, %30, %cst_15 {dimension_numbers = #tpu.dot_dimension_numbers<[1], [0], [0], [1], [0, 0, 1, 1], [], []>} : vector<1x64xf32>, vector<64x128xf32>, vector<1x128xf32> -> vector<1x128xf32>
    %32 = arith.mulf %31, %19 : vector<1x128xf32>
    %cst_16 = arith.constant dense<0.000000e+00> : vector<1xf32>
    %33 = vector.multi_reduction <add>, %32, %cst_16 [1] : vector<1x128xf32> to vector<1xf32>
    %34 = vector.shape_cast %33 : vector<1xf32> to vector<1x1xf32>
    %35 = vector.shape_cast %34 : vector<1x1xf32> to vector<1x1xf32>
    %36 = vector.broadcast %35 : vector<1x1xf32> to vector<1x128xf32>
    %c0_17 = arith.constant 0 : index
    %c0_18 = arith.constant 0 : index
    %37 = vector.load %arg4[%c0_17, %c0_18] : memref<1x128xf32, #tpu.memory_space<vmem>>, vector<1x128xf32>
    tpu.vector_store %arg4[%c0_17, %c0_18], %36 {strides = array<i32>} : memref<1x128xf32, #tpu.memory_space<vmem>>, vector<1x128xf32>,
    return
  }
}

</mosaic_0001>

<bundles_post_ra>
// kernel: _lambda_.1
= control target key start
LH: loop header
LB: loop body
LE: loop exit
PB: predicated region body
PF: predicated region fallthrough
CT: control target
= control target key end

     0   :  { %v451_v1 = vmov 0   ;;  %v452_v4 = vmov 0.0   ;;  %vm453_vm0 = vmmov 0   ;;  %s571_s0 = inlined_call_operand.vmem [shape: s32[8,1], index: 0, kind: input, shape index: {}]   ;;  %s572_s1 = inlined_call_operand.vmem [shape: bf16[4,256], index: 1, kind: input, shape index: {}]   ;;  %s573_s2 = inlined_call_operand.vmem [shape: bf16[256,128], index: 2, kind: input, shape index: {}]   ;;  %s574_s3 = inlined_call_operand.vmem [shape: f32[64,128], index: 3, kind: input, shape index: {}]   ;;  %s575_s4 = inlined_call_operand.hbm [shape: f32[1,128], index: 4, kind: output, shape index: {}]  }
   0x1   :  { %v218_v0 = vld [vmem:[%s571_s0] sm:$0xff]  ;;  %410 = vset.pattern.permute.xlu0 %v451_v1  ;;  %v411_v2 = vld [vmem:[%s573_s2 + $0x78] sm:$0xff]   ;;  %387 = vmatprep.subr.mxu1 %v452_v4  ;;  %v413_v5 = vld [vmem:[%s573_s2 + $0x70] sm:$0xff]  }
   0x2   :  { %222 = vperm.xlu0 %410, %v218_v0   ;;  %v412_v3 = vld [vmem:[%s573_s2 + $0x38] sm:$0xff]   ;;  %356 = vmatprep.subr.bf16.mxu0 %v411_v2  ;;  %v414_v6 = vld [vmem:[%s573_s2 + $0x30] sm:$0xff]   ;;  %v415_v7 = vld [vmem:[%s573_s2 + $0x68] sm:$0xff]  }
   0x3   :  { %357 = vmatpush3.bf16.msra.mxu0 %v412_v3  ;;  %v416_v8 = vld [vmem:[%s573_s2 + $0x28] sm:$0xff]   ;;  %v417_v9 = vld [vmem:[%s573_s2 + $0x60] sm:$0xff]   ;;  %403 = vmatprep.mubr.msk.f32.mxu1 %vm453_vm0, %v452_v4  ;;  %v419_v11 = vld [vmem:[%s573_s2 + $0x58] sm:$0xff]  }
   0x4   :  { %358 = vmatprep.subr.bf16.mxu0 %v413_v5  ;;  %v418_v10 = vld [vmem:[%s573_s2 + $0x20] sm:$0xff]   ;;  %v420_v12 = vld [vmem:[%s573_s2 + $0x18] sm:$0xff]   ;;  %v421_v15 = vld [vmem:[%s573_s2 + $0x50] sm:$0xff]  }
   0x5   :  { %v337_v13 = vld.sshfl [vmem:[%s572_s1] sm:$0x33 pattern:$0x76325410]  ;;  %v243_v14 = vld [vmem:[%s574_s3 + $0x38] sm:$0xff]  ;;  %v242_v17 = vld [vmem:[%s574_s3 + $0x30] sm:$0xff] }
   0x6   :  { %v60_v16 = vcombine.high %v337_v13, %v337_v13  ;;  %388 = vmatpush3.msra.mxu1 %v243_v14  ;;  %v241_v18 = vld [vmem:[%s574_s3 + $0x28] sm:$0xff] }
   0x7   :  { %359 = vmatpush3.bf16.msra.mxu0 %v414_v6  ;;  %389 = vmatprep.subr.mxu1 %v452_v4 }
   0x8   :  { %360 = vmatprep.subr.bf16.mxu0 %v415_v7  ;;  %191 = vmatprep.mubr.bf16.mxu0 %v60_v16 }
   0x9   :  { %390 = vmatpush3.msra.mxu1 %v242_v17 }
   0xb   :  { %361 = vmatpush3.bf16.msra.mxu0 %v416_v8 }
   0xc   :  { %362 = vmatprep.subr.bf16.mxu0 %v417_v9 }
   0xf   :  { %363 = vmatpush3.bf16.msra.mxu0 %v418_v10 }
  0x10   :  { %364 = vmatprep.subr.bf16.mxu0 %v419_v11 }
  0x11   :  { %9 = vsyncpa [#allocation3], 0  ;;  %v422_v19 = vld [vmem:[%s573_s2 + $0x10] sm:$0xff]   ;;  %391 = vmatprep.subr.mxu1 %v452_v4  ;;  %v240_v20 = vld [vmem:[%s574_s3 + $0x20] sm:$0xff]  ;;  %v219_v29 = vlaneseq  ;;  %vm227_vm1 = vcmask 523264   ;;  %vm208_vm3 = vcmask 1043456  }
  0x12   :  { %v423_v21 = vld [vmem:[%s573_s2 + $0x48] sm:$0xff]   ;;  %392 = vmatpush3.msra.mxu1 %v241_v18  ;;  %v239_v22 = vld [vmem:[%s574_s3 + $0x18] sm:$0xff]  ;;  %v238_v24 = vld [vmem:[%s574_s3 + $0x10] sm:$0xff]  ;;  %vm318_vm4 = vcmask 1040384  }
  0x13   :  { %365 = vmatpush3.bf16.msra.mxu0 %v420_v12  ;;  %393 = vmatprep.subr.mxu1 %v452_v4  ;;  %v424_v23 = vld [vmem:[%s573_s2 + $0x8] sm:$0xff]   ;;  %v425_v25 = vld [vmem:[%s573_s2 + $0x40] sm:$0xff]   ;;  %v220_v30 = vand.u32 127, %v219_v29 }
  0x14   :  { %366 = vmatprep.subr.bf16.mxu0 %v421_v15  ;;  %394 = vmatpush3.msra.mxu1 %v240_v20  ;;  %v237_v26 = vld [vmem:[%s574_s3 + $0x8] sm:$0xff]  ;;  %v426_v27 = vld [vmem:[%s573_s2] sm:$0xff]   ;;  %s454_s2 = smov [#allocation2]  }
  0x15   :  { %395 = vmatprep.subr.mxu1 %v452_v4  ;;  %v236_v28 = vld [vmem:[%s574_s3] sm:$0xff]  ;;  %s329_s3 = sshll.u32 %s454_s2, 4  ;;  %s330_s3 = int_to_ptr.vmem [resolvable:$true] %s329_s3 }
  0x16   :  { %396 = vmatpush3.msra.mxu1 %v239_v22  ;;  %s429_s12 = scalar_lea.vmem %s330_s3, 16  ;;  %s433_s13 = scalar_lea.vmem %s330_s3, 32 }
  0x17   :  { %367 = vmatpush3.bf16.msra.mxu0 %v422_v19  ;;  %397 = vmatprep.subr.mxu1 %v452_v4  ;;  %p430_p0 = scmp.ne.s32.totalorder %s330_s3, %s429_s12  ;;  %p434_p1 = scmp.lt.s32.totalorder %s330_s3, %s330_s3 }
  0x18   :  { %368 = vmatprep.subr.bf16.mxu0 %v423_v21  ;;  %398 = vmatpush3.msra.mxu1 %v238_v24  ;;  %p435_p2 = scmp.lt.s32.totalorder %s433_s13, %s429_s12 }
  0x19   :  { %399 = vmatprep.subr.mxu1 %v452_v4 }
  0x1a   :  { %400 = vmatpush3.msra.mxu1 %v237_v26  ;;  %p436_p3 = por %p435_p2, %p434_p1 }
  0x1b   :  { %369 = vmatpush3.bf16.msra.mxu0 %v424_v23  ;;  %401 = vmatprep.subr.mxu1 %v452_v4 }
  0x1c   :  { %370 = vmatprep.subr.bf16.mxu0 %v425_v25  ;;  %402 = vmatpush3.msra.mxu1 %v236_v28  ;;  %p437_p4 = pnand %p436_p3, %p430_p0 }
  0x1f   :  { %371 = vmatpush3.bf16.msra.mxu0 %v426_v27 }
  0x22   :  { %192 = vmatmul.mubr.bf16.vlgmr.msra.gmra.mxu0 %v337_v13 }
  0x7d   :  { %v223_v31 = vpop.permute.xlu0 %222 }
  0x7e   :  { %vm224_vm2 = vcmp.eq.s32.totalorder %v223_v31, %v220_v30 }
  0x7f   :  { %v354_v32 = vsel %vm224_vm2, 1.0, %v452_v4 }
  0x80   :  { %v228_v33 = vsel %vm227_vm1, %v354_v32, 0.0 }
  0x81   :  { %v229_v34 = vrot.slane %v228_v33, 4 }
  0x83   :  { %v230_v35 = vadd.f32 %v229_v34, %v228_v33 }
  0x85   :  { %v231_v36 = vrot.slane %v230_v35, 2 }
  0x87   :  { %v232_v37 = vadd.f32 %v231_v36, %v230_v35 }
  0x89   :  { %v233_v38 = vrot.slane %v232_v37, 1 }
  0x8b   :  { %v234_v39 = vadd.f32 %v233_v38, %v232_v37 }
  0x8d   :  { %v235_v40 = vmul.f32 0.125, %v234_v39 }
  0x8f   :  { %404 = vmatmul.mubr.msk.f32.vlgmr.msra.gmra.mxu1 %vm227_vm1, %v235_v40 }
  0xe2   :  { %v372_v41 = vpop.f32.mrf.mxu0 }
  0xe4   :  { %v373_v42 = vpop.f32.mrf.mxu0 }
  0xe5   :  { %v374_v45 = vadd.f32 %v373_v42, %v372_v41 }
  0xe6   :  { %v375_v43 = vpop.f32.mrf.mxu0 }
  0xe7   :  { %v199_v46 = vmul.f32 %v374_v45, %v374_v45 }
  0xe8   :  { %v376_v44 = vpop.f32.mrf.mxu0 }
  0xe9   :  { %v200_v47 = vmul.f32 %v374_v45, %v199_v46 }
  0xeb   :  { %v201_v48 = vmul.f32 0.044715, %v200_v47 }
  0xed   :  { %v202_v49 = vadd.f32 %v374_v45, %v201_v48 }
  0xef   :  { %v203_v50 = vmul.f32 0.7978846, %v202_v49 }
  0xf1   :  { %427 = vtanh.f32 %v203_v50 }
  0xfe   :  { %v428_v51 = vpop.eup %427 }
  0xff   :  { %v205_v52 = vadd.f32 1.0, %v428_v51 }
 0x101   :  { %v206_v53 = vmul.f32 0.5, %v205_v52 }
 0x103   :  { %v207_v54 = vmul.f32 %v374_v45, %v206_v53 }
 0x105   :  { %v209_v55 = vsel %vm208_vm3, %v207_v54, 0.0 }
 0x106   :  { %v210_v56 = vrot.slane %v209_v55, 4 }
 0x108   :  { %v211_v57 = vadd.f32 %v210_v56, %v209_v55 }
 0x10a   :  { %v212_v58 = vrot.slane %v211_v57, 2 }
 0x10c   :  { %v213_v59 = vadd.f32 %v212_v58, %v211_v57 }
 0x10e   :  { %v214_v60 = vrot.slane %v213_v59, 1 }
 0x110   :  { %v215_v61 = vadd.f32 %v214_v60, %v213_v59 }
 0x112   :  { %v217_v62 = vmul.f32 0.25, %v215_v61 }
 0x14f   :  { %v313_v63 = vpop.f32.mrf.mxu1 }
 0x150   :  { %v317_v0 = vmul.f32 %v313_v63, %v217_v62 }
 0x151   :  { %v405_v1 = vpop.f32.mrf.mxu1 }
 0x152   :  { %v319_v2 = vsel %vm318_vm4, %v317_v0, 0.0 }
 0x153   :  { %320 = vadd.xlane.f32.xlu0 %v319_v2 }
 0x1dc   :  { %v321_v3 = vpop.xlane.xlu0 %320 }
 0x1dd   :  { %322 = vst [vmem:[#allocation2] sm:$0x1] %v321_v3 }
 0x1de   :  { %440 = shalt.err (!%p437_p4)
}
 0x1df   :  { %332 = dma.vmem_to_hbm [thread:$0]  %s330_s3, 16, %s575_s4, [#allocation3]  }
 0x1e0   :  { %449 = dma.done.wait [#allocation3], 16  }
 0x1e1   :  { %450 = vsyncadd [#allocation3], 4294967280 }
 0x1e2   :  { %336 = vsyncpa [#allocation3], 1 }

</bundles_post_ra>
